<compile_context>
chip_gen: v5e
topology: v5e:2x2
jax: 0.10.0
libtpu: 0.0.40
codegen_flags: <defaults>
</compile_context>

<pallas_src>
import math

import jax
import jax.numpy as jnp
from jax.experimental import pallas as pl
from jax.experimental.pallas import tpu as pltpu


# ---------------------------------------------------------------------------
# Kernel 1: gate computation (single invocation, bf16 weights, f32 accum)
# ---------------------------------------------------------------------------
def igm_gate_kernel(p1_ref, p2_ref,
                    wc1_ref, wc2_ref, wc3_ref, wc4_ref,
                    wr1_ref, wr2_ref, wr3_ref, wr4_ref, wa_ref,
                    bmuc_ref, bc_ref, bmur_ref, br_ref, ba_ref,
                    out_ref):
    p1 = p1_ref[...]                      # (Bp, D)  f32
    p2 = p2_ref[...]                      # (Bp, D)  f32
    wdt = wc1_ref.dtype                   # weight dtype (bf16)

    def mm(x, w_ref):                     # MXU dot, f32 accumulation
        return jnp.dot(x.astype(wdt), w_ref[...],
                       preferred_element_type=jnp.float32)

    mu_c = jax.nn.sigmoid(mm(p1, wc1_ref) + mm(p2, wc2_ref) + bmuc_ref[...])
    mu_r = jax.nn.sigmoid(mm(p1, wr1_ref) + mm(p2, wr2_ref) + bmur_ref[...])

    conflict = jnp.tanh(mm(mu_c * p1, wc3_ref)
                        + mm((1.0 - mu_c) * p2, wc4_ref) + bc_ref[...])
    refine = jnp.tanh(mm(mu_r * p1, wr3_ref)
                      + mm(mu_r * p2, wr4_ref) + br_ref[...])

    adapt = refine + (1.0 - mu_r) * conflict
    interact = jnp.tanh(mm(adapt, wa_ref) + ba_ref[...])        # (Bp, D) f32

    out_ref[...] = interact.astype(out_ref.dtype)


# ---------------------------------------------------------------------------
# Kernel 2: streamed, lane-dense broadcast multiply (same-dtype operands)
# ---------------------------------------------------------------------------
def igm_mul_kernel(gate_ref, x1_ref, out_ref):
    # gate_ref: (1, 1, Df)   x1_ref / out_ref: (1, Ts, Df)
    out_ref[...] = (x1_ref[...] * gate_ref[...]).astype(out_ref.dtype)


# ---------------------------------------------------------------------------
# Wrapper helpers
# ---------------------------------------------------------------------------
def _fold_factor(S, D):
    """Smallest divisor f of S such that f*D is a multiple of 128 (lane-dense)."""
    if D % 128 == 0 or S <= 1:
        return 1
    for f in range(2, S + 1):
        if S % f == 0 and (f * D) % 128 == 0:
            return f
    return 1


def _mul_target_bytes():
    """Per-generation streaming tile target: ~8 MiB v7x, ~4 MiB v6e, ~2 MiB v5e."""
    try:
        kind = jax.devices()[0].device_kind.lower()
    except Exception:
        return 4 << 20
    if "v5" in kind:
        return 2 << 20
    if "v7" in kind:
        return 8 << 20
    return 4 << 20


def _choose_seq_tile(Sf, Df, itemsize, target_bytes):
    """Sequence tile: prefer a multiple-of-8 divisor of Sf near the byte target;
    otherwise a multiple-of-8 tile with a ragged (masked) last grid block."""
    max_rows = max(8, int(target_bytes // max(1, Df * itemsize)))
    if Sf <= max_rows:
        return Sf                                   # full axis, small enough
    t = (min(max_rows, Sf) // 8) * 8                # >= 8 by construction
    tt = t
    while tt >= 8:
        if Sf % tt == 0:
            return tt                               # exact divisor
        tt -= 8
    return t                                        # ragged last block via cdiv grid


# ---------------------------------------------------------------------------
# Forward
# ---------------------------------------------------------------------------
def igm_forward(input1, input2, fused_params):
    (wc1, wc2, wc3, wc4, wr1, wr2, wr3, wr4, wa,
     bmuc, bc, bmur, br, ba) = fused_params
    B, S, D = input1.shape
    out_dtype = input1.dtype

    # 1) Sequence max-pool in the wrapper; gating math in f32.
    p1 = jnp.max(input1, axis=1).astype(jnp.float32)             # (B, D)
    p2 = jnp.max(input2, axis=1).astype(jnp.float32)             # (B, D)

    # 2) Pad the batch (MXU M-dim) to a sublane multiple.
    Bp = max(8, ((B + 7) // 8) * 8)
    if Bp != B:
        pad = ((0, Bp - B), (0, 0))
        p1 = jnp.pad(p1, pad)
        p2 = jnp.pad(p2, pad)

    # 3) Gate kernel (all weights resident; explicit VMEM limit).
    weights = (wc1, wc2, wc3, wc4, wr1, wr2, wr3, wr4, wa)
    wbytes = sum(int(w.size) * w.dtype.itemsize for w in weights)
    actbytes = 16 * Bp * max(D, 128) * 4
    gate_vmem = int(min(64 << 20, max(32 << 20, 2 * (wbytes + actbytes) + (4 << 20))))

    vmem = pl.BlockSpec(memory_space=pltpu.MemorySpace.VMEM)
    gate_full = pl.pallas_call(
        igm_gate_kernel,
        out_shape=jax.ShapeDtypeStruct((Bp, D), out_dtype),
        in_specs=[vmem] * 16,
        out_specs=vmem,
        compiler_params=pltpu.CompilerParams(vmem_limit_bytes=gate_vmem),
    )(p1, p2, wc1, wc2, wc3, wc4, wr1, wr2, wr3, wr4, wa,
      bmuc, bc, bmur, br, ba)
    gate = gate_full[:B][:, None, :]                              # (B, 1, D)

    # 4) Lane-dense layout for the streaming multiply.
    f = _fold_factor(S, D)
    Sf, Df = S // f, D * f
    x1f = input1.reshape(B, Sf, Df)
    gatef = jnp.tile(gate, (1, 1, f)) if f > 1 else gate          # (B, 1, Df)

    Ts = _choose_seq_tile(Sf, Df, input1.dtype.itemsize, _mul_target_bytes())
    ns = pl.cdiv(Sf, Ts)
    # Keep enough grid steps for both v7x TensorCores (cheap heuristic).
    while B * ns < 4 and Ts > 8 and Ts % 16 == 0:
        Ts //= 2
        ns = pl.cdiv(Sf, Ts)

    itm = input1.dtype.itemsize
    tile_bytes = Ts * Df * (itm + jnp.dtype(out_dtype).itemsize)
    mul_vmem = int(min(64 << 20,
                       max(32 << 20, 2 * tile_bytes + 2 * Df * itm + (4 << 20))))

    out = pl.pallas_call(
        igm_mul_kernel,
        out_shape=jax.ShapeDtypeStruct((B, Sf, Df), out_dtype),
        grid=(B, ns),
        in_specs=[
            pl.BlockSpec((1, 1, Df), lambda b, s: (b, 0, 0)),      # gate (per batch)
            pl.BlockSpec((1, Ts, Df), lambda b, s: (b, s, 0)),     # input1 stream
        ],
        out_specs=pl.BlockSpec((1, Ts, Df), lambda b, s: (b, s, 0)),
        compiler_params=pltpu.CompilerParams(
            dimension_semantics=("parallel", "parallel"),
            vmem_limit_bytes=mul_vmem),
    )(gatef, x1f)

    return out.reshape(B, S, D)


# ---------------------------------------------------------------------------
# Parameter construction (mirrors the PyTorch module's shapes / init ranges)
# ---------------------------------------------------------------------------
def init_params(key, dim):
    keys = jax.random.split(key, 14)
    lim_w = 1.0 / math.sqrt(dim)          # nn.Linear default init range
    lim_b = math.sqrt(dim)                # explicit uniform_(-sqrt(dim), sqrt(dim))
    wnames = ["w_c1", "w_c2", "w_c3", "w_c4", "w_r1", "w_r2", "w_r3", "w_r4", "w_a"]
    ws = {n: jax.random.uniform(keys[i], (dim, dim), jnp.float32, -lim_w, lim_w)
          for i, n in enumerate(wnames)}          # nn.Linear weight (out, in)
    bnames = ["b_mu_c", "b_c", "b_mu_r", "b_r", "b_a"]
    bs = {n: jax.random.uniform(keys[9 + i], (dim,), jnp.float32, -lim_b, lim_b)
          for i, n in enumerate(bnames)}
    return ws, bs


def fuse_params(ws, bs, weight_dtype=jnp.bfloat16):
    """Transpose weights into x @ W^T form and cast to the MXU weight dtype
    (bf16 by default — halves weight DMA/VMEM, f32 accumulation in-kernel)."""
    wnames = ("w_c1", "w_c2", "w_c3", "w_c4",
              "w_r1", "w_r2", "w_r3", "w_r4", "w_a")
    bnames = ("b_mu_c", "b_c", "b_mu_r", "b_r", "b_a")
    weights = tuple(ws[n].T.astype(weight_dtype) for n in wnames)     # 9 x (D, D)
    biases = tuple(bs[n][None, :].astype(jnp.float32) for n in bnames)  # 5 x (1, D)
    return weights + biases


def igm_reference(input1, input2, ws, bs, weight_dtype=None):
    """Pure-JAX reference written like the PyTorch forward.  If weight_dtype is
    given, matmul operands are quantized the same way as the kernel (f32 accum)."""
    p1 = jnp.max(input1, axis=1).astype(jnp.float32)
    p2 = jnp.max(input2, axis=1).astype(jnp.float32)
    if weight_dtype is None:
        lin = lambda x, w: x @ w.T
    else:
        lin = lambda x, w: jnp.dot(x.astype(weight_dtype),
                                   w.T.astype(weight_dtype),
                                   preferred_element_type=jnp.float32)
    mu_c = jax.nn.sigmoid(lin(p1, ws["w_c1"]) + lin(p2, ws["w_c2"]) + bs["b_mu_c"])
    conflict = jnp.tanh(lin(mu_c * p1, ws["w_c3"])
                        + lin((1 - mu_c) * p2, ws["w_c4"]) + bs["b_c"])
    mu_r = jax.nn.sigmoid(lin(p1, ws["w_r1"]) + lin(p2, ws["w_r2"]) + bs["b_mu_r"])
    refine = jnp.tanh(lin(mu_r * p1, ws["w_r3"])
                      + lin(mu_r * p2, ws["w_r4"]) + bs["b_r"])
    adapt = refine + (1 - mu_r) * conflict
    interact = jnp.tanh(lin(adapt, ws["w_a"]) + bs["b_a"])
    return (interact[:, None, :]).astype(input1.dtype) * input1


if __name__ == "__main__":
    B, S, D = 2, 8, 32
    key = jax.random.PRNGKey(0)
    k1, k2, kp = jax.random.split(key, 3)
    input1 = jax.random.normal(k1, (B, S, D), jnp.float32)
    input2 = jax.random.normal(k2, (B, S, D), jnp.float32)

    ws, bs = init_params(kp, D)
    fused = fuse_params(ws, bs, weight_dtype=jnp.bfloat16)

    out = jax.block_until_ready(igm_forward(input1, input2, fused))

    # Reference with matched bf16 weight quantization (kernel accumulates f32).
    ref = igm_reference(input1, input2, ws, bs, weight_dtype=jnp.bfloat16)

    assert out.shape == (B, S, D)
    assert out.dtype == input1.dtype
    assert jnp.allclose(out, ref, atol=2e-2, rtol=2e-2), float(
        jnp.max(jnp.abs(out - ref)))
    print("KERNEL_OK")
</pallas_src>

<mosaic_0001>
module attributes {stable_mosaic.version = 11 : i64} {
  func.func @igm_gate_kernel(%arg0: memref<8x32xf32, #tpu.memory_space<vmem>>, %arg1: memref<8x32xf32, #tpu.memory_space<vmem>>, %arg2: memref<32x32xbf16, #tpu.memory_space<vmem>>, %arg3: memref<32x32xbf16, #tpu.memory_space<vmem>>, %arg4: memref<32x32xbf16, #tpu.memory_space<vmem>>, %arg5: memref<32x32xbf16, #tpu.memory_space<vmem>>, %arg6: memref<32x32xbf16, #tpu.memory_space<vmem>>, %arg7: memref<32x32xbf16, #tpu.memory_space<vmem>>, %arg8: memref<32x32xbf16, #tpu.memory_space<vmem>>, %arg9: memref<32x32xbf16, #tpu.memory_space<vmem>>, %arg10: memref<32x32xbf16, #tpu.memory_space<vmem>>, %arg11: memref<1x32xf32, #tpu.memory_space<vmem>>, %arg12: memref<1x32xf32, #tpu.memory_space<vmem>>, %arg13: memref<1x32xf32, #tpu.memory_space<vmem>>, %arg14: memref<1x32xf32, #tpu.memory_space<vmem>>, %arg15: memref<1x32xf32, #tpu.memory_space<vmem>>, %arg16: memref<8x32xf32, #tpu.memory_space<vmem>>) attributes {dimension_semantics = [], scalar_prefetch = 0 : i64, scratch_operands = 0 : i64, tpu.core_type = #tpu.core_type<tc>} {
    %c0 = arith.constant 0 : index
    %c0_0 = arith.constant 0 : index
    %0 = vector.load %arg0[%c0, %c0_0] : memref<8x32xf32, #tpu.memory_space<vmem>>, vector<8x32xf32>
    %c0_1 = arith.constant 0 : index
    %c0_2 = arith.constant 0 : index
    %1 = vector.load %arg1[%c0_1, %c0_2] : memref<8x32xf32, #tpu.memory_space<vmem>>, vector<8x32xf32>
    %2 = arith.truncf %0 : vector<8x32xf32> to vector<8x32xbf16>
    %c0_3 = arith.constant 0 : index
    %c0_4 = arith.constant 0 : index
    %3 = vector.load %arg2[%c0_3, %c0_4] : memref<32x32xbf16, #tpu.memory_space<vmem>>, vector<32x32xbf16>
    %cst = arith.constant dense<0.000000e+00> : vector<8x32xf32>
    %4 = tpu.matmul %2, %3, %cst {dimension_numbers = #tpu.dot_dimension_numbers<[1], [0], [0], [1], [0, 0, 1, 1], [], []>} : vector<8x32xbf16>, vector<32x32xbf16>, vector<8x32xf32> -> vector<8x32xf32>
    %5 = arith.truncf %1 : vector<8x32xf32> to vector<8x32xbf16>
    %c0_5 = arith.constant 0 : index
    %c0_6 = arith.constant 0 : index
    %6 = vector.load %arg3[%c0_5, %c0_6] : memref<32x32xbf16, #tpu.memory_space<vmem>>, vector<32x32xbf16>
    %cst_7 = arith.constant dense<0.000000e+00> : vector<8x32xf32>
    %7 = tpu.matmul %5, %6, %cst_7 {dimension_numbers = #tpu.dot_dimension_numbers<[1], [0], [0], [1], [0, 0, 1, 1], [], []>} : vector<8x32xbf16>, vector<32x32xbf16>, vector<8x32xf32> -> vector<8x32xf32>
    %8 = arith.addf %4, %7 : vector<8x32xf32>
    %c0_8 = arith.constant 0 : index
    %c0_9 = arith.constant 0 : index
    %9 = vector.load %arg11[%c0_8, %c0_9] : memref<1x32xf32, #tpu.memory_space<vmem>>, vector<1x32xf32>
    %10 = vector.broadcast %9 : vector<1x32xf32> to vector<8x32xf32>
    %11 = arith.addf %8, %10 : vector<8x32xf32>
    %12 = arith.negf %11 : vector<8x32xf32>
    %13 = math.exp %12 : vector<8x32xf32>
    %cst_10 = arith.constant 1.000000e+00 : f32
    %14 = vector.broadcast %cst_10 : f32 to vector<8x32xf32>
    %15 = arith.addf %14, %13 : vector<8x32xf32>
    %16 = arith.divf %14, %15 : vector<8x32xf32>
    %17 = arith.truncf %0 : vector<8x32xf32> to vector<8x32xbf16>
    %c0_11 = arith.constant 0 : index
    %c0_12 = arith.constant 0 : index
    %18 = vector.load %arg6[%c0_11, %c0_12] : memref<32x32xbf16, #tpu.memory_space<vmem>>, vector<32x32xbf16>
    %cst_13 = arith.constant dense<0.000000e+00> : vector<8x32xf32>
    %19 = tpu.matmul %17, %18, %cst_13 {dimension_numbers = #tpu.dot_dimension_numbers<[1], [0], [0], [1], [0, 0, 1, 1], [], []>} : vector<8x32xbf16>, vector<32x32xbf16>, vector<8x32xf32> -> vector<8x32xf32>
    %20 = arith.truncf %1 : vector<8x32xf32> to vector<8x32xbf16>
    %c0_14 = arith.constant 0 : index
    %c0_15 = arith.constant 0 : index
    %21 = vector.load %arg7[%c0_14, %c0_15] : memref<32x32xbf16, #tpu.memory_space<vmem>>, vector<32x32xbf16>
    %cst_16 = arith.constant dense<0.000000e+00> : vector<8x32xf32>
    %22 = tpu.matmul %20, %21, %cst_16 {dimension_numbers = #tpu.dot_dimension_numbers<[1], [0], [0], [1], [0, 0, 1, 1], [], []>} : vector<8x32xbf16>, vector<32x32xbf16>, vector<8x32xf32> -> vector<8x32xf32>
    %23 = arith.addf %19, %22 : vector<8x32xf32>
    %c0_17 = arith.constant 0 : index
    %c0_18 = arith.constant 0 : index
    %24 = vector.load %arg13[%c0_17, %c0_18] : memref<1x32xf32, #tpu.memory_space<vmem>>, vector<1x32xf32>
    %25 = vector.broadcast %24 : vector<1x32xf32> to vector<8x32xf32>
    %26 = arith.addf %23, %25 : vector<8x32xf32>
    %27 = arith.negf %26 : vector<8x32xf32>
    %28 = math.exp %27 : vector<8x32xf32>
    %cst_19 = arith.constant 1.000000e+00 : f32
    %29 = vector.broadcast %cst_19 : f32 to vector<8x32xf32>
    %30 = arith.addf %29, %28 : vector<8x32xf32>
    %31 = arith.divf %29, %30 : vector<8x32xf32>
    %32 = arith.mulf %16, %0 : vector<8x32xf32>
    %33 = arith.truncf %32 : vector<8x32xf32> to vector<8x32xbf16>
    %c0_20 = arith.constant 0 : index
    %c0_21 = arith.constant 0 : index
    %34 = vector.load %arg4[%c0_20, %c0_21] : memref<32x32xbf16, #tpu.memory_space<vmem>>, vector<32x32xbf16>
    %cst_22 = arith.constant dense<0.000000e+00> : vector<8x32xf32>
    %35 = tpu.matmul %33, %34, %cst_22 {dimension_numbers = #tpu.dot_dimension_numbers<[1], [0], [0], [1], [0, 0, 1, 1], [], []>} : vector<8x32xbf16>, vector<32x32xbf16>, vector<8x32xf32> -> vector<8x32xf32>
    %cst_23 = arith.constant 1.000000e+00 : f32
    %36 = vector.broadcast %cst_23 : f32 to vector<8x32xf32>
    %37 = arith.subf %36, %16 : vector<8x32xf32>
    %38 = arith.mulf %37, %1 : vector<8x32xf32>
    %39 = arith.truncf %38 : vector<8x32xf32> to vector<8x32xbf16>
    %c0_24 = arith.constant 0 : index
    %c0_25 = arith.constant 0 : index
    %40 = vector.load %arg5[%c0_24, %c0_25] : memref<32x32xbf16, #tpu.memory_space<vmem>>, vector<32x32xbf16>
    %cst_26 = arith.constant dense<0.000000e+00> : vector<8x32xf32>
    %41 = tpu.matmul %39, %40, %cst_26 {dimension_numbers = #tpu.dot_dimension_numbers<[1], [0], [0], [1], [0, 0, 1, 1], [], []>} : vector<8x32xbf16>, vector<32x32xbf16>, vector<8x32xf32> -> vector<8x32xf32>
    %42 = arith.addf %35, %41 : vector<8x32xf32>
    %c0_27 = arith.constant 0 : index
    %c0_28 = arith.constant 0 : index
    %43 = vector.load %arg12[%c0_27, %c0_28] : memref<1x32xf32, #tpu.memory_space<vmem>>, vector<1x32xf32>
    %44 = vector.broadcast %43 : vector<1x32xf32> to vector<8x32xf32>
    %45 = arith.addf %42, %44 : vector<8x32xf32>
    %46 = math.tanh %45 : vector<8x32xf32>
    %47 = arith.mulf %31, %0 : vector<8x32xf32>
    %48 = arith.truncf %47 : vector<8x32xf32> to vector<8x32xbf16>
    %c0_29 = arith.constant 0 : index
    %c0_30 = arith.constant 0 : index
    %49 = vector.load %arg8[%c0_29, %c0_30] : memref<32x32xbf16, #tpu.memory_space<vmem>>, vector<32x32xbf16>
    %cst_31 = arith.constant dense<0.000000e+00> : vector<8x32xf32>
    %50 = tpu.matmul %48, %49, %cst_31 {dimension_numbers = #tpu.dot_dimension_numbers<[1], [0], [0], [1], [0, 0, 1, 1], [], []>} : vector<8x32xbf16>, vector<32x32xbf16>, vector<8x32xf32> -> vector<8x32xf32>
    %51 = arith.mulf %31, %1 : vector<8x32xf32>
    %52 = arith.truncf %51 : vector<8x32xf32> to vector<8x32xbf16>
    %c0_32 = arith.constant 0 : index
    %c0_33 = arith.constant 0 : index
    %53 = vector.load %arg9[%c0_32, %c0_33] : memref<32x32xbf16, #tpu.memory_space<vmem>>, vector<32x32xbf16>
    %cst_34 = arith.constant dense<0.000000e+00> : vector<8x32xf32>
    %54 = tpu.matmul %52, %53, %cst_34 {dimension_numbers = #tpu.dot_dimension_numbers<[1], [0], [0], [1], [0, 0, 1, 1], [], []>} : vector<8x32xbf16>, vector<32x32xbf16>, vector<8x32xf32> -> vector<8x32xf32>
    %55 = arith.addf %50, %54 : vector<8x32xf32>
    %c0_35 = arith.constant 0 : index
    %c0_36 = arith.constant 0 : index
    %56 = vector.load %arg14[%c0_35, %c0_36] : memref<1x32xf32, #tpu.memory_space<vmem>>, vector<1x32xf32>
    %57 = vector.broadcast %56 : vector<1x32xf32> to vector<8x32xf32>
    %58 = arith.addf %55, %57 : vector<8x32xf32>
    %59 = math.tanh %58 : vector<8x32xf32>
    %cst_37 = arith.constant 1.000000e+00 : f32
    %60 = vector.broadcast %cst_37 : f32 to vector<8x32xf32>
    %61 = arith.subf %60, %31 : vector<8x32xf32>
    %62 = arith.mulf %61, %46 : vector<8x32xf32>
    %63 = arith.addf %59, %62 : vector<8x32xf32>
    %64 = arith.truncf %63 : vector<8x32xf32> to vector<8x32xbf16>
    %c0_38 = arith.constant 0 : index
    %c0_39 = arith.constant 0 : index
    %65 = vector.load %arg10[%c0_38, %c0_39] : memref<32x32xbf16, #tpu.memory_space<vmem>>, vector<32x32xbf16>
    %cst_40 = arith.constant dense<0.000000e+00> : vector<8x32xf32>
    %66 = tpu.matmul %64, %65, %cst_40 {dimension_numbers = #tpu.dot_dimension_numbers<[1], [0], [0], [1], [0, 0, 1, 1], [], []>} : vector<8x32xbf16>, vector<32x32xbf16>, vector<8x32xf32> -> vector<8x32xf32>
    %c0_41 = arith.constant 0 : index
    %c0_42 = arith.constant 0 : index
    %67 = vector.load %arg15[%c0_41, %c0_42] : memref<1x32xf32, #tpu.memory_space<vmem>>, vector<1x32xf32>
    %68 = vector.broadcast %67 : vector<1x32xf32> to vector<8x32xf32>
    %69 = arith.addf %66, %68 : vector<8x32xf32>
    %70 = math.tanh %69 : vector<8x32xf32>
    %c0_43 = arith.constant 0 : index
    %c0_44 = arith.constant 0 : index
    %71 = vector.load %arg16[%c0_43, %c0_44] : memref<8x32xf32, #tpu.memory_space<vmem>>, vector<8x32xf32>
    tpu.vector_store %arg16[%c0_43, %c0_44], %70 {strides = array<i32>} : memref<8x32xf32, #tpu.memory_space<vmem>>, vector<8x32xf32>,
    return
  }
}

</mosaic_0001>

<bundles_post_ra>
// kernel: tpu_custom_call.1
= control target key start
LH: loop header
LB: loop body
LE: loop exit
PB: predicated region body
PF: predicated region fallthrough
CT: control target
= control target key end

     0   :  { %s1245_s0 = inlined_call_operand.hbm [shape: f32[8,32], index: 0, kind: input, shape index: {}]   ;;  %s1246_s1 = inlined_call_operand.hbm [shape: f32[8,32], index: 1, kind: input, shape index: {}]   ;;  %s1247_s2 = inlined_call_operand.hbm [shape: bf16[32,32], index: 2, kind: input, shape index: {}]   ;;  %s1248_s3 = inlined_call_operand.hbm [shape: bf16[32,32], index: 3, kind: input, shape index: {}]   ;;  %s1249_s4 = inlined_call_operand.hbm [shape: bf16[32,32], index: 4, kind: input, shape index: {}]   ;;  %s1250_s5 = inlined_call_operand.hbm [shape: bf16[32,32], index: 5, kind: input, shape index: {}]   ;;  %s1251_s6 = inlined_call_operand.hbm [shape: bf16[32,32], index: 6, kind: input, shape index: {}]   ;;  %s1252_s7 = inlined_call_operand.hbm [shape: bf16[32,32], index: 7, kind: input, shape index: {}]   ;;  %s1253_s8 = inlined_call_operand.hbm [shape: bf16[32,32], index: 8, kind: input, shape index: {}]   ;;  %s1254_s9 = inlined_call_operand.hbm [shape: bf16[32,32], index: 9, kind: input, shape index: {}]   ;;  %s1255_s10 = inlined_call_operand.hbm [shape: bf16[32,32], index: 10, kind: input, shape index: {}]   ;;  %s1256_s11 = inlined_call_operand.vmem [shape: f32[1,32], index: 11, kind: input, shape index: {}]   ;;  %s1257_s12 = inlined_call_operand.vmem [shape: f32[1,32], index: 12, kind: input, shape index: {}]   ;;  %s1258_s13 = inlined_call_operand.vmem [shape: f32[1,32], index: 13, kind: input, shape index: {}]   ;;  %s1259_s14 = inlined_call_operand.vmem [shape: f32[1,32], index: 14, kind: input, shape index: {}]   ;;  %s1260_s15 = inlined_call_operand.vmem [shape: f32[1,32], index: 15, kind: input, shape index: {}]   ;;  %s1261_s16 = inlined_call_operand.hbm [shape: f32[8,32], index: 16, kind: output, shape index: {}]  }
   0x1   :  { %1262 = sst [smem:[#allocation28_spill]] %s1245_s0 }
   0x2   :  { %21 = vsyncpa [#allocation3], 0 }
   0x3   :  { %22 = vsyncpa [#allocation6], 0 }
   0x4   :  { %23 = vsyncpa [#allocation9], 0 }
   0x5   :  { %24 = vsyncpa [#allocation12], 0 }
   0x6   :  { %25 = vsyncpa [#allocation15], 0 }
   0x7   :  { %26 = vsyncpa [#allocation18], 0  ;;  %s44_s23 = sshll.u32 %s1246_s1, 4  ;;  %s45_s23 = int_to_ptr.hbm [resolvable:$true] %s44_s23 }
   0x8   :  { %27 = vsyncpa [#allocation4], 0  ;;  %s1046_s24 = smov [#allocation5]   ;;  %s67_s28 = sshll.u32 %s1248_s3, 4  ;;  %s68_s28 = int_to_ptr.hbm [resolvable:$true] %s67_s28 }
   0x9   :  { %s46_s25 = sshll.u32 %s1046_s24, 4  ;;  %s1047_s29 = smov [#allocation8]   ;;  %s47_s25 = int_to_ptr.vmem [resolvable:$true] %s46_s25 }
   0xa   :  { %49 = dma.hbm_to_vmem [thread:$0]  %s45_s23, 128, %s47_s25, [#allocation6]  }
   0xb   :  { %s69_s30 = sshll.u32 %s1047_s29, 4  ;;  %s93_s18 = sshll.u32 %s1250_s5, 4  ;;  %s70_s30 = int_to_ptr.vmem [resolvable:$true] %s69_s30  ;;  %s94_s18 = int_to_ptr.hbm [resolvable:$true] %s93_s18 }
   0xc   :  { %s1048_s1 = smov 64   ;;  %s1049_s19 = smov 4  }
   0xd   :  { %75 = dma.hbm_to_vmem [thread:$0]  %s68_s28, 256, %s70_s30, [#allocation9], %s1048_s1, %s1048_s1, %s1049_s19  }
   0xe   :  { %s119_s22 = sshll.u32 %s1252_s7, 4  ;;  %s1050_s3 = smov [#allocation11]   ;;  %s120_s22 = int_to_ptr.hbm [resolvable:$true] %s119_s22 }
   0xf   :  { %s95_s23 = sshll.u32 %s1050_s3, 4  ;;  %s1051_s5 = smov [#allocation14]   ;;  %s96_s23 = int_to_ptr.vmem [resolvable:$true] %s95_s23 }
  0x10   :  { %101 = dma.hbm_to_vmem [thread:$0]  %s94_s18, 256, %s96_s23, [#allocation12], %s1048_s1, %s1048_s1, %s1049_s19  }
  0x11   :  { %s121_s24 = sshll.u32 %s1051_s5, 4  ;;  %s145_s27 = sshll.u32 %s1254_s9, 4  ;;  %s122_s24 = int_to_ptr.vmem [resolvable:$true] %s121_s24  ;;  %s146_s27 = int_to_ptr.hbm [resolvable:$true] %s145_s27 }
  0x12   :  { %127 = dma.hbm_to_vmem [thread:$0]  %s120_s22, 256, %s122_s24, [#allocation15], %s1048_s1, %s1048_s1, %s1049_s19  }
  0x13   :  { %s1263_s29 = sld [smem:[#allocation28_spill]]  ;;  %s1052_s0 = smov [#allocation17]  }
  0x14   :  { %s147_s17 = sshll.u32 %s1052_s0, 4  ;;  %s1053_s18 = smov [#allocation2]   ;;  %s148_s17 = int_to_ptr.vmem [resolvable:$true] %s147_s17 }
  0x15   :  { %153 = dma.hbm_to_vmem [thread:$0]  %s146_s27, 256, %s148_s17, [#allocation18], %s1048_s1, %s1048_s1, %s1049_s19  }
  0x16   :  { %s35_s9 = sshll.u32 %s1053_s18, 4  ;;  %s54_s3 = sshll.u32 %s1247_s2, 4  ;;  %s36_s9 = int_to_ptr.vmem [resolvable:$true] %s35_s9  ;;  %s55_s3 = int_to_ptr.hbm [resolvable:$true] %s54_s3 }
  0x17   :  { %s80_s5 = sshll.u32 %s1249_s4, 4  ;;  %s1054_s24 = smov [#allocation7]   ;;  %s81_s5 = int_to_ptr.hbm [resolvable:$true] %s80_s5 }
  0x18   :  { %s56_s25 = sshll.u32 %s1054_s24, 4  ;;  %s1055_s26 = smov [#allocation10]   ;;  %s57_s25 = int_to_ptr.vmem [resolvable:$true] %s56_s25 }
  0x19   :  { %s33_s30 = sshll.u32 %s1263_s29, 4  ;;  %s82_s27 = sshll.u32 %s1055_s26, 4  ;;  %s34_s30 = int_to_ptr.hbm [resolvable:$true] %s33_s30  ;;  %s83_s27 = int_to_ptr.vmem [resolvable:$true] %s82_s27 }
  0x1a   :  { %38 = dma.hbm_to_vmem [thread:$0]  %s34_s30, 128, %s36_s9, [#allocation3]  }
  0x1b   :  { %62 = dma.hbm_to_vmem [thread:$0]  %s55_s3, 256, %s57_s25, [#allocation6], %s1048_s1, %s1048_s1, %s1049_s19  }
  0x1c   :  { %s106_s2 = sshll.u32 %s1251_s6, 4  ;;  %s132_s30 = sshll.u32 %s1253_s8, 4  ;;  %s107_s2 = int_to_ptr.hbm [resolvable:$true] %s106_s2  ;;  %s133_s30 = int_to_ptr.hbm [resolvable:$true] %s132_s30 }
  0x1d   :  { %88 = dma.hbm_to_vmem [thread:$0]  %s81_s5, 256, %s83_s27, [#allocation9], %s1048_s1, %s1048_s1, %s1049_s19  }
  0x1e   :  { %s1056_s0 = smov [#allocation13]   ;;  %s1057_s18 = smov [#allocation16]  }
  0x1f   :  { %s108_s17 = sshll.u32 %s1056_s0, 4  ;;  %s134_s6 = sshll.u32 %s1057_s18, 4  ;;  %s109_s17 = int_to_ptr.vmem [resolvable:$true] %s108_s17  ;;  %s135_s6 = int_to_ptr.vmem [resolvable:$true] %s134_s6 }
  0x20   :  { %114 = dma.hbm_to_vmem [thread:$0]  %s107_s2, 256, %s109_s17, [#allocation12], %s1048_s1, %s1048_s1, %s1049_s19  }
  0x21   :  { %s158_s21 = sshll.u32 %s1255_s10, 4  ;;  %s1058_s8 = smov [#allocation19]   ;;  %s159_s21 = int_to_ptr.hbm [resolvable:$true] %s158_s21 }
  0x22   :  { %140 = dma.hbm_to_vmem [thread:$0]  %s133_s30, 256, %s135_s6, [#allocation15], %s1048_s1, %s1048_s1, %s1049_s19  }
  0x23   :  { %s160_s3 = sshll.u32 %s1058_s8, 4  ;;  %s161_s3 = int_to_ptr.vmem [resolvable:$true] %s160_s3 }
  0x24   :  { %166 = dma.hbm_to_vmem [thread:$0]  %s159_s21, 256, %s161_s3, [#allocation18], %s1048_s1, %s1048_s1, %s1049_s19  }
  0x25   :  { %1032 = dma.done.wait [#allocation3], 128  }
  0x26   :  { %1033 = vsyncadd [#allocation3], 4294967168 }
  0x27   :  { %1034 = dma.done.wait [#allocation6], 384  }
  0x28   :  { %1035 = vsyncadd [#allocation6], 4294966912 }
  0x29   :  { %1036 = dma.done.wait [#allocation9], 512  }
  0x2a   :  { %1037 = vsyncadd [#allocation9], 4294966784 }
  0x2b   :  { %1038 = dma.done.wait [#allocation12], 512  }
  0x2c   :  { %1039 = vsyncadd [#allocation12], 4294966784 }
  0x2d   :  { %1040 = dma.done.wait [#allocation15], 512  }
  0x2e   :  { %1041 = vsyncadd [#allocation15], 4294966784 }
  0x2f   :  { %1042 = dma.done.wait [#allocation18], 512  }
  0x30   :  { %1043 = vsyncadd [#allocation18], 4294966784  ;;  %v696_v0 = vld [vmem:[#allocation8 + $0x8] sm:$0xff]  ;;  %v694_v1 = vld [vmem:[#allocation7 + $0x8] sm:$0xff]  ;;  %vm246_vm0 = vcmask 261120   ;;  %s595_s7 = sshll.u32 %s1261_s16, 4  ;;  %s596_s7 = int_to_ptr.hbm [resolvable:$true] %s595_s7 }
  0x31   :  { %v700_v2 = vld [vmem:[#allocation14 + $0x8] sm:$0xff]  ;;  %v698_v3 = vld [vmem:[#allocation13 + $0x8] sm:$0xff]  ;;  %v695_v4 = vld [vmem:[#allocation8] sm:$0xff]  ;;  %256 = vmatpush.bf16.msra.mxu0 %v696_v0  ;;  %284 = vmatpush.bf16.msra.mxu1 %v694_v1 }
  0x32   :  { %v693_v5 = vld [vmem:[#allocation7] sm:$0xff]  ;;  %v699_v6 = vld [vmem:[#allocation14] sm:$0xff]  ;;  %v1205_v8 = vld [vmem:[#allocation5] sm:$0xff]  ;;  %341 = vmatpush.bf16.msra.mxu2 %v700_v2  ;;  %366 = vmatpush.bf16.msra.mxu3 %v698_v3 }
  0x33   :  { %v697_v7 = vld [vmem:[#allocation13] sm:$0xff]  ;;  %v1207_v9 = vld [vmem:[#allocation2] sm:$0xff]  ;;  %v229_v10 = vpack.c.bf16 %v1205_v8, %v1205_v8  ;;  %v702_v12 = vld [vmem:[#allocation10 + $0x8] sm:$0xff] }
  0x34   :  { %v224_v11 = vpack.c.bf16 %v1207_v9, %v1207_v9  ;;  %v725_v13 = vld [vmem:[%s1256_s11] ss:$0 sm:$0xff]  ;;  %v704_v14 = vld [vmem:[#allocation11 + $0x8] sm:$0xff]  ;;  %v706_v18 = vld [vmem:[#allocation16 + $0x8] sm:$0xff] }
  0x35   :  { %257 = vmatpush.bf16.msra.mxu0 %v695_v4  ;;  %285 = vmatpush.bf16.msra.mxu1 %v693_v5  ;;  %v708_v17 = vld [vmem:[#allocation17 + $0x8] sm:$0xff]  ;;  %v701_v19 = vld [vmem:[#allocation10] sm:$0xff]  ;;  %v703_v21 = vld [vmem:[#allocation11] sm:$0xff] }
  0x36   :  { %342 = vmatpush.bf16.msra.mxu2 %v699_v6  ;;  %367 = vmatpush.bf16.msra.mxu3 %v697_v7  ;;  %v707_v22 = vld [vmem:[#allocation17] sm:$0xff]  ;;  %v705_v23 = vld [vmem:[#allocation16] sm:$0xff]  ;;  %v710_v5 = vld [vmem:[#allocation19 + $0x8] sm:$0xff] }
  0x37   :  { %v726_v26 = vld [vmem:[%s1258_s13] ss:$0 sm:$0xff]  ;;  %v709_v6 = vld [vmem:[#allocation19] sm:$0xff] }
  0x38   :  { %618 = vmatmul.msk.bf16.vlgmr.msra.gmra.mxu0 %vm246_vm0, %v229_v10  ;;  %627 = vmatmul.msk.bf16.vlgmr.msra.gmra.mxu1 %vm246_vm0, %v224_v11 }
  0x39   :  { %637 = vmatmul.msk.bf16.vlgmr.msra.gmra.mxu2 %vm246_vm0, %v229_v10  ;;  %646 = vmatmul.msk.bf16.vlgmr.msra.gmra.mxu3 %vm246_vm0, %v224_v11 }
  0x3a   :  { %459 = vmatpush.bf16.msrb.mxu1 %v702_v12  ;;  %431 = vmatpush.bf16.msrb.mxu0 %v704_v14  ;;  %v727_v12 = vld [vmem:[%s1257_s12] ss:$0 sm:$0xff] }
  0x3b   :  { %505 = vmatpush.bf16.msrb.mxu2 %v708_v17  ;;  %533 = vmatpush.bf16.msrb.mxu3 %v706_v18  ;;  %v728_v14 = vld [vmem:[%s1259_s14] ss:$0 sm:$0xff]  ;;  %s1059_s14 = smov [#allocation20]  }
  0x3c   :  { %s593_s25 = sshll.u32 %s1059_s14, 4  ;;  %s594_s25 = int_to_ptr.vmem [resolvable:$true] %s593_s25 }
  0x3e   :  { %460 = vmatpush.bf16.msrb.mxu1 %v701_v19  ;;  %432 = vmatpush.bf16.msrb.mxu0 %v703_v21 }
  0x3f   :  { %506 = vmatpush.bf16.msrb.mxu2 %v707_v22  ;;  %534 = vmatpush.bf16.msrb.mxu3 %v705_v23 }
  0x42   :  { %579 = vmatpush.bf16.msra.mxu0 %v710_v5 }
  0x46   :  { %580 = vmatpush.bf16.msra.mxu0 %v709_v6 }
  0xb5   :  { %v259_v15 = vpop.f32.mrf.mxu0  ;;  %v287_v16 = vpop.f32.mrf.mxu1 }
  0xb6   :  { %v288_v20 = vadd.f32 %v287_v16, %v259_v15 }
  0xb8   :  { %v295_v24 = vadd.f32 %v725_v13, %v288_v20 }
  0xba   :  { %v628_v25 = vmul.f32 -1.442695, %v295_v24 }
  0xbc   :  { %730 = vpow2.f32 %v628_v25  ;;  %v344_v27 = vpop.f32.mrf.mxu2  ;;  %v369_v28 = vpop.f32.mrf.mxu3 }
  0xbd   :  { %v370_v29 = vadd.f32 %v369_v28, %v344_v27  ;;  %v261_v30 = vpop.f32.mrf.mxu0  ;;  %v289_v31 = vpop.f32.mrf.mxu1  ;;  %v729_v27 = vld [vmem:[%s1260_s15] ss:$0 sm:$0xff] }
  0xbf   :  { %v377_v32 = vadd.f32 %v726_v26, %v370_v29 }
  0xc1   :  { %v647_v33 = vmul.f32 -1.442695, %v377_v32 }
  0xc2   :  { %v731_v34 = vpop.eup %730 }
  0xc3   :  { %v299_v35 = vadd.f32 1.0, %v731_v34  ;;  %732 = vpow2.f32 %v647_v33 }
  0xc4   :  { %v346_v36 = vpop.f32.mrf.mxu2  ;;  %v371_v37 = vpop.f32.mrf.mxu3 }
  0xc5   :  { %734 = vrcp.f32 %v299_v35  ;;  %v311_v43 = vand.u32 2147483648, %v299_v35  ;;  %vm305_vm1 = vweird.f32 %v299_v35  ;;  %v309_v45 = vand.u32 2147483647, %v299_v35 }
  0xc7   :  { %v312_v49 = vor.u32 1.1754944e-38, %v311_v43  ;;  %vm310_vm4 = vcmp.eq.f32.partialorder %v309_v45, 8.507059e+37 }
  0xc9   :  { %v733_v38 = vpop.eup %732 }
  0xca   :  { %v381_v39 = vadd.f32 1.0, %v733_v38 }
  0xcb   :  { %v735_v40 = vpop.eup %734 }
  0xcc   :  { %v301_v41 = vmul.f32 %v735_v40, %v299_v35  ;;  %736 = vrcp.f32 %v381_v39  ;;  %vm306_vm2 = vweird.f32 %v735_v40  ;;  %v393_v55 = vand.u32 2147483648, %v381_v39 }
  0xcd   :  { %vm307_vm3 = vmor %vm305_vm1, %vm306_vm2  ;;  %v391_v57 = vand.u32 2147483647, %v381_v39  ;;  %vm387_vm6 = vweird.f32 %v381_v39 }
  0xce   :  { %v302_v42 = vsub.f32 1.0, %v301_v41  ;;  %v394_v62 = vor.u32 1.1754944e-38, %v393_v55 }
  0xcf   :  { %vm392_vm8 = vcmp.eq.f32.partialorder %v391_v57, 8.507059e+37 }
  0xd0   :  { %v303_v44 = vmul.f32 %v735_v40, %v302_v42 }
  0xd2   :  { %v737_v46 = vpop.eup %736  ;;  %v304_v47 = vadd.f32 %v735_v40, %v303_v44 }
  0xd3   :  { %v383_v48 = vmul.f32 %v737_v46, %v381_v39  ;;  %vm388_vm5 = vweird.f32 %v737_v46 }
  0xd4   :  { %v308_v50 = vsel %vm307_vm3, %v735_v40, %v304_v47  ;;  %vm389_vm7 = vmor %vm387_vm6, %vm388_vm5 }
  0xd5   :  { %v384_v51 = vsub.f32 1.0, %v383_v48  ;;  %v313_v52 = vsel %vm310_vm4, %v312_v49, %v308_v50 }
  0xd6   :  { %v397_v53 = vmul.f32 %v313_v52, %v1207_v9  ;;  %v403_v54 = vsub.f32 1.0, %v313_v52 }
  0xd7   :  { %v385_v56 = vmul.f32 %v737_v46, %v384_v51 }
  0xd8   :  { %v398_v58 = vpack.c.bf16 %v397_v53, %v397_v53  ;;  %v404_v59 = vmul.f32 %v403_v54, %v1205_v8 }
  0xd9   :  { %v386_v60 = vadd.f32 %v737_v46, %v385_v56 }
  0xda   :  { %665 = vmatmul.msk.bf16.vlgmr.msrb.gmra.mxu1 %vm246_vm0, %v398_v58  ;;  %v405_v61 = vpack.c.bf16 %v404_v59, %v404_v59 }
  0xdb   :  { %v390_v63 = vsel %vm389_vm7, %v737_v46, %v386_v60 }
  0xdc   :  { %656 = vmatmul.msk.bf16.vlgmr.msrb.gmra.mxu0 %vm246_vm0, %v405_v61  ;;  %v395_v0 = vsel %vm392_vm8, %v394_v62, %v390_v63 }
  0xdd   :  { %v478_v1 = vmul.f32 %v395_v0, %v1205_v8  ;;  %v472_v2 = vmul.f32 %v395_v0, %v1207_v9  ;;  %v546_v20 = vsub.f32 1.0, %v395_v0 }
  0xdf   :  { %v479_v3 = vpack.c.bf16 %v478_v1, %v478_v1  ;;  %v473_v4 = vpack.c.bf16 %v472_v2, %v472_v2 }
  0xe1   :  { %674 = vmatmul.msk.bf16.vlgmr.msrb.gmra.mxu2 %vm246_vm0, %v479_v3  ;;  %683 = vmatmul.msk.bf16.vlgmr.msrb.gmra.mxu3 %vm246_vm0, %v473_v4 }
 0x157   :  { %v462_v7 = vpop.f32.mrf.mxu1 }
 0x159   :  { %v434_v10 = vpop.f32.mrf.mxu0 }
 0x15a   :  { %v463_v11 = vadd.f32 %v462_v7, %v434_v10 }
 0x15c   :  { %v470_v13 = vadd.f32 %v727_v12, %v463_v11 }
 0x15e   :  { %738 = vtanh.f32 %v470_v13 }
 0x15f   :  { %v464_v8 = vpop.f32.mrf.mxu1 }
 0x161   :  { %v436_v9 = vpop.f32.mrf.mxu0 }
 0x164   :  { %v508_v15 = vpop.f32.mrf.mxu2  ;;  %v536_v16 = vpop.f32.mrf.mxu3 }
 0x165   :  { %v537_v17 = vadd.f32 %v536_v16, %v508_v15  ;;  %v739_v19 = vpop.eup %738 }
 0x166   :  { %v547_v23 = vmul.f32 %v739_v19, %v546_v20 }
 0x167   :  { %v544_v18 = vadd.f32 %v728_v14, %v537_v17 }
 0x169   :  { %740 = vtanh.f32 %v544_v18 }
 0x16c   :  { %v510_v21 = vpop.f32.mrf.mxu2  ;;  %v538_v22 = vpop.f32.mrf.mxu3 }
 0x16f   :  { %v741_v24 = vpop.eup %740 }
 0x170   :  { %v548_v25 = vadd.f32 %v741_v24, %v547_v23 }
 0x172   :  { %v549_v26 = vpack.c.bf16 %v548_v25, %v548_v25 }
 0x174   :  { %692 = vmatmul.msk.bf16.vlgmr.msra.gmra.mxu0 %vm246_vm0, %v549_v26 }
 0x1f1   :  { %v582_v28 = vpop.f32.mrf.mxu0 }
 0x1f2   :  { %v583_v29 = vadd.f32 %v729_v27, %v582_v28 }
 0x1f4   :  { %742 = vtanh.f32 %v583_v29 }
 0x1f9   :  { %v584_v30 = vpop.f32.mrf.mxu0 }
 0x1fa   :  { %v743_v31 = vpop.eup %742 }
 0x1fb   :  { %587 = vst.msk [vmem:[#allocation20] sm:$0xff] %vm246_vm0, %v743_v31 }
 0x1fc   :  { %598 = dma.vmem_to_hbm [thread:$0]  %s594_s25, 128, %s596_s7, [#allocation4]  }
 0x1fd   :  { %1044 = dma.done.wait [#allocation4], 128  }
 0x1fe   :  { %1045 = vsyncadd [#allocation4], 4294967168 }
 0x1ff   :  { %603 = vsyncpa [#allocation3], 1 }
 0x200   :  { %604 = vsyncpa [#allocation6], 1 }
 0x201   :  { %605 = vsyncpa [#allocation9], 1 }
 0x202   :  { %606 = vsyncpa [#allocation12], 1 }
 0x203   :  { %607 = vsyncpa [#allocation15], 1 }
 0x204   :  { %608 = vsyncpa [#allocation18], 1 }
 0x205   :  { %609 = vsyncpa [#allocation4], 1 }

</bundles_post_ra>
